<compile_context>
chip_gen: v7x
topology: tpu7x:2x2x1
jax: 0.10.0
libtpu: 0.0.40
codegen_flags: <defaults>
</compile_context>

<pallas_src>
import functools

import jax
import jax.numpy as jnp
from jax import lax
from jax.experimental import pallas as pl
from jax.experimental.pallas import tpu as pltpu


def _residual_predictor_kernel(
    # inputs
    sig_ref,            # (Tc, B, S)  chunk of signals
    wg1_ref, bg1_ref,   # encoder layer 1: (S, H), (1, H)
    wg2_ref, bg2_ref,   # encoder layer 2: (H, N), (1, N)
    w1z_ref, w1u_ref, b1_ref,   # fused f|h layer 1: (N, 2H), (S, 2H), (1, 2H)
    w2f_ref, bf2_ref,           # zero-padded dynamic layer 2: (2H, N), (1, N)
    w2h_ref, bh2_ref,           # zero-padded predictor layer 2: (2H, O), (1, O)
    # outputs
    y_ref,              # (Tc, B, O)
    st_ref,             # (Tc, B, N)
    # scratch
    z_sc,               # VMEM (B, N)       latent state carried across chunks
    h1_sc,              # VMEM (Tc, B, 2H)  staging: u-projection, then h1
    *,
    sample_time: float,
    chunk: int,
    unroll: bool,
):
    c = pl.program_id(0)

    # --- encoder: initialize latent state from the first timestep -----------
    @pl.when(c == 0)
    def _():
        u0 = sig_ref[0]                                        # (B, S)
        hg = jnp.tanh(
            jnp.dot(u0, wg1_ref[...], preferred_element_type=jnp.float32)
            + bg1_ref[...]
        )
        z_sc[...] = (
            jnp.dot(hg, wg2_ref[...], preferred_element_type=jnp.float32)
            + bg2_ref[...]
        )

    Tc, B, S = sig_ref.shape
    twoH = w1z_ref.shape[1]
    N = w2f_ref.shape[1]
    O = w2h_ref.shape[1]

    # --- hoist weights / bias broadcasts out of the time loop ---------------
    w1z = w1z_ref[...]                                         # (N, 2H)
    w2f = w2f_ref[...]                                         # (2H, N)
    bf2 = jnp.broadcast_to(bf2_ref[...], (B, N))               # (B, N)
    dt = jnp.float32(sample_time)

    # --- input-dependent half of layer 1, batched over the whole chunk ------
    u_flat = sig_ref[...].reshape(Tc * B, S)                   # (Tc*B, S)
    u_proj = (
        jnp.dot(u_flat, w1u_ref[...], preferred_element_type=jnp.float32)
        + jnp.broadcast_to(b1_ref[...], (Tc * B, twoH))
    )                                                          # (Tc*B, 2H)
    h1_sc[...] = u_proj.reshape(Tc, B, twoH)

    # --- sequential Euler rollout (only the irreducible recurrence) ---------
    def body(i, z):
        # record state at this timestep (chunk-resident VMEM output tile)
        st_ref[i] = z.astype(st_ref.dtype)

        # fused layer 1 of f and h: columns [0:H] = hf, [H:2H] = hh
        h1 = jnp.tanh(
            jnp.dot(z, w1z, preferred_element_type=jnp.float32) + h1_sc[i]
        )                                                      # (B, 2H)
        h1_sc[i] = h1

        # Euler step (zero-padded weight selects the hf half)
        dz = jnp.dot(h1, w2f, preferred_element_type=jnp.float32) + bf2
        return z + dt * dz

    z_final = lax.fori_loop(0, chunk, body, z_sc[...], unroll=unroll)
    z_sc[...] = z_final

    # --- predictor output, batched over the whole chunk ---------------------
    h1_all = h1_sc[...].reshape(Tc * B, twoH)                  # (Tc*B, 2H)
    y = (
        jnp.dot(h1_all, w2h_ref[...], preferred_element_type=jnp.float32)
        + jnp.broadcast_to(bh2_ref[...], (Tc * B, O))
    )                                                          # (Tc*B, O)
    y_ref[...] = y.reshape(Tc, B, O).astype(y_ref.dtype)


def residual_predictor_forward(signals, params, seq_len, sample_time=0.05,
                               chunk=None):
    """signals: [seq_len, batch, num_signals] float32 (time-major, as in PyTorch)."""
    T, B, S = signals.shape
    assert T == seq_len
    N = params["wg2"].shape[1]      # num_states
    O = params["wh2"].shape[1]      # num_outputs
    H = params["wg1"].shape[1]      # hidden

    if chunk is None:
        chunk = min(seq_len, 16)
    num_chunks = pl.cdiv(seq_len, chunk)
    T_pad = num_chunks * chunk
    if T_pad != seq_len:
        # pad time axis; padded steps are computed but sliced off afterwards
        signals = jnp.pad(signals, ((0, T_pad - seq_len), (0, 0), (0, 0)))

    # --- one-time weight fusion in plain JAX (outside the kernel) -----------
    # Layer 1 of f and h fused along the output dim:
    w1z = jnp.concatenate([params["wf1z"], params["wh1z"]], axis=1)   # (N, 2H)
    w1u = jnp.concatenate([params["wf1u"], params["wh1u"]], axis=1)   # (S, 2H)
    b1 = jnp.concatenate([params["bf1"], params["bh1"]], axis=1)      # (1, 2H)
    # Layer 2 zero-padded to act on the full fused hidden slab (no in-kernel
    # lane slicing needed):
    w2f = jnp.concatenate(
        [params["wf2"], jnp.zeros((H, N), jnp.float32)], axis=0)      # (2H, N)
    w2h = jnp.concatenate(
        [jnp.zeros((H, O), jnp.float32), params["wh2"]], axis=0)      # (2H, O)

    full = lambda shape: pl.BlockSpec(shape, lambda c: tuple(0 for _ in shape))

    grid_spec = pltpu.PrefetchScalarGridSpec(
        num_scalar_prefetch=0,
        grid=(num_chunks,),
        in_specs=[
            pl.BlockSpec((chunk, B, S), lambda c: (c, 0, 0)),   # signals chunk
            full((S, H)), full((1, H)),                         # encoder L1
            full((H, N)), full((1, N)),                         # encoder L2
            full((N, 2 * H)), full((S, 2 * H)), full((1, 2 * H)),   # fused L1
            full((2 * H, N)), full((1, N)),                     # dynamic L2
            full((2 * H, O)), full((1, O)),                     # predictor L2
        ],
        out_specs=[
            pl.BlockSpec((chunk, B, O), lambda c: (c, 0, 0)),   # y_pred chunk
            pl.BlockSpec((chunk, B, N), lambda c: (c, 0, 0)),   # states chunk
        ],
        scratch_shapes=[
            pltpu.VMEM((B, N), jnp.float32),                    # latent carry
            pltpu.VMEM((chunk, B, 2 * H), jnp.float32),         # h1 staging
        ],
    )

    y_pred, states = pl.pallas_call(
        functools.partial(
            _residual_predictor_kernel,
            sample_time=sample_time,
            chunk=chunk,
            unroll=(chunk <= 16),
        ),
        out_shape=(
            jax.ShapeDtypeStruct((T_pad, B, O), jnp.float32),
            jax.ShapeDtypeStruct((T_pad, B, N), jnp.float32),
        ),
        grid_spec=grid_spec,
        compiler_params=pltpu.CompilerParams(
            dimension_semantics=("arbitrary",),   # sequential carry over time
        ),
    )(
        signals,
        params["wg1"], params["bg1"], params["wg2"], params["bg2"],
        w1z, w1u, b1,
        w2f, params["bf2"],
        w2h, params["bh2"],
    )
    if T_pad != seq_len:
        y_pred = y_pred[:seq_len]
        states = states[:seq_len]
    q = None  # non-variational config (config['vae'] = False)
    return y_pred, states, q


def residual_predictor_reference(signals, params, seq_len, sample_time=0.05):
    """Pure-JAX reference for correctness checking."""
    u0 = signals[0]
    hg = jnp.tanh(u0 @ params["wg1"] + params["bg1"])
    z = hg @ params["wg2"] + params["bg2"]

    states, ys = [], []
    for t in range(seq_len):
        u = signals[t]
        states.append(z)
        hh = jnp.tanh(z @ params["wh1z"] + u @ params["wh1u"] + params["bh1"])
        ys.append(hh @ params["wh2"] + params["bh2"])
        hf = jnp.tanh(z @ params["wf1z"] + u @ params["wf1u"] + params["bf1"])
        z = z + sample_time * (hf @ params["wf2"] + params["bf2"])
    return jnp.stack(ys, axis=0), jnp.stack(states, axis=0), None


def init_params(key, num_signals, num_states, hidden, num_outputs):
    ks = jax.random.split(key, 10)
    sc = 0.3
    return {
        "wg1": sc * jax.random.normal(ks[0], (num_signals, hidden), jnp.float32),
        "bg1": jnp.zeros((1, hidden), jnp.float32),
        "wg2": sc * jax.random.normal(ks[1], (hidden, num_states), jnp.float32),
        "bg2": jnp.zeros((1, num_states), jnp.float32),
        "wf1z": sc * jax.random.normal(ks[2], (num_states, hidden), jnp.float32),
        "wf1u": sc * jax.random.normal(ks[3], (num_signals, hidden), jnp.float32),
        "bf1": jnp.zeros((1, hidden), jnp.float32),
        "wf2": sc * jax.random.normal(ks[4], (hidden, num_states), jnp.float32),
        "bf2": jnp.zeros((1, num_states), jnp.float32),
        "wh1z": sc * jax.random.normal(ks[5], (num_states, hidden), jnp.float32),
        "wh1u": sc * jax.random.normal(ks[6], (num_signals, hidden), jnp.float32),
        "bh1": jnp.zeros((1, hidden), jnp.float32),
        "wh2": sc * jax.random.normal(ks[7], (hidden, num_outputs), jnp.float32),
        "bh2": jnp.zeros((1, num_outputs), jnp.float32),
    }


if __name__ == "__main__":
    seq_len, batch = 8, 8
    num_signals, num_states, hidden, num_outputs = 4, 8, 32, 2
    sample_time = 0.05

    key = jax.random.PRNGKey(0)
    k_sig, k_par = jax.random.split(key)
    signals = jax.random.normal(
        k_sig, (seq_len, batch, num_signals), jnp.float32
    )
    params = init_params(k_par, num_signals, num_states, hidden, num_outputs)

    y_pred, states, q = residual_predictor_forward(
        signals, params, seq_len, sample_time
    )
    jax.block_until_ready((y_pred, states))

    y_ref, st_ref, _ = residual_predictor_reference(
        signals, params, seq_len, sample_time
    )
    assert y_pred.shape == (seq_len, batch, num_outputs)
    assert states.shape == (seq_len, batch, num_states)
    assert jnp.allclose(y_pred, y_ref, atol=1e-5, rtol=1e-5)
    assert jnp.allclose(states, st_ref, atol=1e-5, rtol=1e-5)

    print("KERNEL_OK")
</pallas_src>

<mosaic_0001>
module attributes {stable_mosaic.version = 11 : i64} {
  func.func @_residual_predictor_kernel(%arg0: i32, %arg1: memref<8x8x4xf32, #tpu.memory_space<vmem>>, %arg2: memref<4x32xf32, #tpu.memory_space<vmem>>, %arg3: memref<1x32xf32, #tpu.memory_space<vmem>>, %arg4: memref<32x8xf32, #tpu.memory_space<vmem>>, %arg5: memref<1x8xf32, #tpu.memory_space<vmem>>, %arg6: memref<8x64xf32, #tpu.memory_space<vmem>>, %arg7: memref<4x64xf32, #tpu.memory_space<vmem>>, %arg8: memref<1x64xf32, #tpu.memory_space<vmem>>, %arg9: memref<64x8xf32, #tpu.memory_space<vmem>>, %arg10: memref<1x8xf32, #tpu.memory_space<vmem>>, %arg11: memref<64x2xf32, #tpu.memory_space<vmem>>, %arg12: memref<1x2xf32, #tpu.memory_space<vmem>>, %arg13: memref<8x8x2xf32, #tpu.memory_space<vmem>>, %arg14: memref<8x8x8xf32, #tpu.memory_space<vmem>>, %arg15: memref<8x8xf32, #tpu.memory_space<vmem>>, %arg16: memref<8x8x64xf32, #tpu.memory_space<vmem>>) attributes {dimension_semantics = [#tpu.dimension_semantics<arbitrary>], iteration_bounds = array<i64: 1>, scalar_prefetch = 0 : i64, scratch_operands = 2 : i64, tpu.core_type = #tpu.core_type<tc>, window_params = [{transform_indices = @transform_0, window_bounds = array<i64: 8, 8, 4>}, {pipeline_mode = #tpu.pipeline_mode<synchronous>, transform_indices = @transform_1, window_bounds = array<i64: 4, 32>}, {pipeline_mode = #tpu.pipeline_mode<synchronous>, transform_indices = @transform_2, window_bounds = array<i64: 1, 32>}, {pipeline_mode = #tpu.pipeline_mode<synchronous>, transform_indices = @transform_3, window_bounds = array<i64: 32, 8>}, {pipeline_mode = #tpu.pipeline_mode<synchronous>, transform_indices = @transform_4, window_bounds = array<i64: 1, 8>}, {pipeline_mode = #tpu.pipeline_mode<synchronous>, transform_indices = @transform_5, window_bounds = array<i64: 8, 64>}, {pipeline_mode = #tpu.pipeline_mode<synchronous>, transform_indices = @transform_6, window_bounds = array<i64: 4, 64>}, {pipeline_mode = #tpu.pipeline_mode<synchronous>, transform_indices = @transform_7, window_bounds = array<i64: 1, 64>}, {pipeline_mode = #tpu.pipeline_mode<synchronous>, transform_indices = @transform_8, window_bounds = array<i64: 64, 8>}, {pipeline_mode = #tpu.pipeline_mode<synchronous>, transform_indices = @transform_9, window_bounds = array<i64: 1, 8>}, {pipeline_mode = #tpu.pipeline_mode<synchronous>, transform_indices = @transform_10, window_bounds = array<i64: 64, 2>}, {pipeline_mode = #tpu.pipeline_mode<synchronous>, transform_indices = @transform_11, window_bounds = array<i64: 1, 2>}, {transform_indices = @transform_12, window_bounds = array<i64: 8, 8, 2>}, {transform_indices = @transform_13, window_bounds = array<i64: 8, 8, 8>}]} {
    %c0_i32 = arith.constant 0 : i32
    %0 = arith.cmpi eq, %arg0, %c0_i32 : i32
    %1 = arith.extui %0 : i1 to i32
    %c0_i32_0 = arith.constant 0 : i32
    %2 = arith.cmpi ne, %1, %c0_i32_0 : i32
    scf.if %2 {
      %c0_97 = arith.constant 0 : index
      %c0_98 = arith.constant 0 : index
      %c0_99 = arith.constant 0 : index
      %182 = vector.load %arg1[%c0_97, %c0_98, %c0_99] : memref<8x8x4xf32, #tpu.memory_space<vmem>>, vector<1x8x4xf32>
      %183 = vector.shape_cast %182 : vector<1x8x4xf32> to vector<8x4xf32>
      %c0_100 = arith.constant 0 : index
      %c0_101 = arith.constant 0 : index
      %184 = vector.load %arg2[%c0_100, %c0_101] : memref<4x32xf32, #tpu.memory_space<vmem>>, vector<4x32xf32>
      %cst_102 = arith.constant dense<0.000000e+00> : vector<8x32xf32>
      %185 = tpu.matmul %183, %184, %cst_102 {dimension_numbers = #tpu.dot_dimension_numbers<[1], [0], [0], [1], [0, 0, 1, 1], [], []>} : vector<8x4xf32>, vector<4x32xf32>, vector<8x32xf32> -> vector<8x32xf32>
      %c0_103 = arith.constant 0 : index
      %c0_104 = arith.constant 0 : index
      %186 = vector.load %arg3[%c0_103, %c0_104] : memref<1x32xf32, #tpu.memory_space<vmem>>, vector<1x32xf32>
      %187 = vector.broadcast %186 : vector<1x32xf32> to vector<8x32xf32>
      %188 = arith.addf %185, %187 : vector<8x32xf32>
      %189 = math.tanh %188 : vector<8x32xf32>
      %c0_105 = arith.constant 0 : index
      %c0_106 = arith.constant 0 : index
      %190 = vector.load %arg4[%c0_105, %c0_106] : memref<32x8xf32, #tpu.memory_space<vmem>>, vector<32x8xf32>
      %cst_107 = arith.constant dense<0.000000e+00> : vector<8x8xf32>
      %191 = tpu.matmul %189, %190, %cst_107 {dimension_numbers = #tpu.dot_dimension_numbers<[1], [0], [0], [1], [0, 0, 1, 1], [], []>} : vector<8x32xf32>, vector<32x8xf32>, vector<8x8xf32> -> vector<8x8xf32>
      %c0_108 = arith.constant 0 : index
      %c0_109 = arith.constant 0 : index
      %192 = vector.load %arg5[%c0_108, %c0_109] : memref<1x8xf32, #tpu.memory_space<vmem>>, vector<1x8xf32>
      %193 = vector.broadcast %192 : vector<1x8xf32> to vector<8x8xf32>
      %194 = arith.addf %191, %193 : vector<8x8xf32>
      %c0_110 = arith.constant 0 : index
      %c0_111 = arith.constant 0 : index
      %195 = vector.load %arg15[%c0_110, %c0_111] : memref<8x8xf32, #tpu.memory_space<vmem>>, vector<8x8xf32>
      tpu.vector_store %arg15[%c0_110, %c0_111], %194 {strides = array<i32>} : memref<8x8xf32, #tpu.memory_space<vmem>>, vector<8x8xf32>,
    } else {
    }
    %c0 = arith.constant 0 : index
    %c0_1 = arith.constant 0 : index
    %3 = vector.load %arg6[%c0, %c0_1] : memref<8x64xf32, #tpu.memory_space<vmem>>, vector<8x64xf32>
    %c0_2 = arith.constant 0 : index
    %c0_3 = arith.constant 0 : index
    %4 = vector.load %arg9[%c0_2, %c0_3] : memref<64x8xf32, #tpu.memory_space<vmem>>, vector<64x8xf32>
    %c0_4 = arith.constant 0 : index
    %c0_5 = arith.constant 0 : index
    %5 = vector.load %arg10[%c0_4, %c0_5] : memref<1x8xf32, #tpu.memory_space<vmem>>, vector<1x8xf32>
    %6 = vector.shape_cast %5 : vector<1x8xf32> to vector<1x8xf32>
    %7 = vector.broadcast %6 : vector<1x8xf32> to vector<8x8xf32>
    %c0_6 = arith.constant 0 : index
    %c0_7 = arith.constant 0 : index
    %c0_8 = arith.constant 0 : index
    %8 = vector.load %arg1[%c0_6, %c0_7, %c0_8] : memref<8x8x4xf32, #tpu.memory_space<vmem>>, vector<8x8x4xf32>
    %9 = vector.shape_cast %8 : vector<8x8x4xf32> to vector<64x4xf32>
    %c0_9 = arith.constant 0 : index
    %c0_10 = arith.constant 0 : index
    %10 = vector.load %arg7[%c0_9, %c0_10] : memref<4x64xf32, #tpu.memory_space<vmem>>, vector<4x64xf32>
    %cst = arith.constant dense<0.000000e+00> : vector<64x64xf32>
    %11 = tpu.matmul %9, %10, %cst {dimension_numbers = #tpu.dot_dimension_numbers<[1], [0], [0], [1], [0, 0, 1, 1], [], []>} : vector<64x4xf32>, vector<4x64xf32>, vector<64x64xf32> -> vector<64x64xf32>
    %c0_11 = arith.constant 0 : index
    %c0_12 = arith.constant 0 : index
    %12 = vector.load %arg8[%c0_11, %c0_12] : memref<1x64xf32, #tpu.memory_space<vmem>>, vector<1x64xf32>
    %13 = vector.shape_cast %12 : vector<1x64xf32> to vector<1x64xf32>
    %14 = vector.broadcast %13 : vector<1x64xf32> to vector<64x64xf32>
    %15 = arith.addf %11, %14 : vector<64x64xf32>
    %16 = vector.shape_cast %15 : vector<64x64xf32> to vector<8x8x64xf32>
    %c0_13 = arith.constant 0 : index
    %c0_14 = arith.constant 0 : index
    %c0_15 = arith.constant 0 : index
    %17 = vector.load %arg16[%c0_13, %c0_14, %c0_15] : memref<8x8x64xf32, #tpu.memory_space<vmem>>, vector<8x8x64xf32>
    tpu.vector_store %arg16[%c0_13, %c0_14, %c0_15], %16 {strides = array<i32>} : memref<8x8x64xf32, #tpu.memory_space<vmem>>, vector<8x8x64xf32>,
    %c0_16 = arith.constant 0 : index
    %c0_17 = arith.constant 0 : index
    %18 = vector.load %arg15[%c0_16, %c0_17] : memref<8x8xf32, #tpu.memory_space<vmem>>, vector<8x8xf32>
    %cst_18 = arith.constant 5.000000e-02 : f32
    %c0_i32_19 = arith.constant 0 : i32
    %19 = arith.index_cast %c0_i32_19 : i32 to index
    %c0_20 = arith.constant 0 : index
    %c0_21 = arith.constant 0 : index
    %20 = vector.load %arg14[%19, %c0_20, %c0_21] : memref<8x8x8xf32, #tpu.memory_space<vmem>>, vector<1x8x8xf32>
    %21 = vector.shape_cast %20 : vector<1x8x8xf32> to vector<8x8xf32>
    %22 = vector.shape_cast %18 : vector<8x8xf32> to vector<1x8x8xf32>
    tpu.vector_store %arg14[%19, %c0_20, %c0_21], %22 {strides = array<i32>} : memref<8x8x8xf32, #tpu.memory_space<vmem>>, vector<1x8x8xf32>,
    %cst_22 = arith.constant dense<0.000000e+00> : vector<8x64xf32>
    %23 = tpu.matmul %18, %3, %cst_22 {dimension_numbers = #tpu.dot_dimension_numbers<[1], [0], [0], [1], [0, 0, 1, 1], [], []>} : vector<8x8xf32>, vector<8x64xf32>, vector<8x64xf32> -> vector<8x64xf32>
    %24 = arith.index_cast %c0_i32_19 : i32 to index
    %c0_23 = arith.constant 0 : index
    %c0_24 = arith.constant 0 : index
    %25 = vector.load %arg16[%24, %c0_23, %c0_24] : memref<8x8x64xf32, #tpu.memory_space<vmem>>, vector<1x8x64xf32>
    %26 = vector.shape_cast %25 : vector<1x8x64xf32> to vector<8x64xf32>
    %27 = arith.addf %23, %26 : vector<8x64xf32>
    %28 = math.tanh %27 : vector<8x64xf32>
    %29 = arith.index_cast %c0_i32_19 : i32 to index
    %c0_25 = arith.constant 0 : index
    %c0_26 = arith.constant 0 : index
    %30 = vector.load %arg16[%29, %c0_25, %c0_26] : memref<8x8x64xf32, #tpu.memory_space<vmem>>, vector<1x8x64xf32>
    %31 = vector.shape_cast %30 : vector<1x8x64xf32> to vector<8x64xf32>
    %32 = vector.shape_cast %28 : vector<8x64xf32> to vector<1x8x64xf32>
    tpu.vector_store %arg16[%29, %c0_25, %c0_26], %32 {strides = array<i32>} : memref<8x8x64xf32, #tpu.memory_space<vmem>>, vector<1x8x64xf32>,
    %cst_27 = arith.constant dense<0.000000e+00> : vector<8x8xf32>
    %33 = tpu.matmul %28, %4, %cst_27 {dimension_numbers = #tpu.dot_dimension_numbers<[1], [0], [0], [1], [0, 0, 1, 1], [], []>} : vector<8x64xf32>, vector<64x8xf32>, vector<8x8xf32> -> vector<8x8xf32>
    %34 = arith.addf %33, %7 : vector<8x8xf32>
    %35 = vector.broadcast %cst_18 : f32 to vector<8x8xf32>
    %36 = arith.mulf %35, %34 : vector<8x8xf32>
    %37 = arith.addf %18, %36 : vector<8x8xf32>
    %c1_i32 = arith.constant 1 : i32
    %38 = arith.index_cast %c1_i32 : i32 to index
    %c0_28 = arith.constant 0 : index
    %c0_29 = arith.constant 0 : index
    %39 = vector.load %arg14[%38, %c0_28, %c0_29] : memref<8x8x8xf32, #tpu.memory_space<vmem>>, vector<1x8x8xf32>
    %40 = vector.shape_cast %39 : vector<1x8x8xf32> to vector<8x8xf32>
    %41 = vector.shape_cast %37 : vector<8x8xf32> to vector<1x8x8xf32>
    tpu.vector_store %arg14[%38, %c0_28, %c0_29], %41 {strides = array<i32>} : memref<8x8x8xf32, #tpu.memory_space<vmem>>, vector<1x8x8xf32>,
    %cst_30 = arith.constant dense<0.000000e+00> : vector<8x64xf32>
    %42 = tpu.matmul %37, %3, %cst_30 {dimension_numbers = #tpu.dot_dimension_numbers<[1], [0], [0], [1], [0, 0, 1, 1], [], []>} : vector<8x8xf32>, vector<8x64xf32>, vector<8x64xf32> -> vector<8x64xf32>
    %43 = arith.index_cast %c1_i32 : i32 to index
    %c0_31 = arith.constant 0 : index
    %c0_32 = arith.constant 0 : index
    %44 = vector.load %arg16[%43, %c0_31, %c0_32] : memref<8x8x64xf32, #tpu.memory_space<vmem>>, vector<1x8x64xf32>
    %45 = vector.shape_cast %44 : vector<1x8x64xf32> to vector<8x64xf32>
    %46 = arith.addf %42, %45 : vector<8x64xf32>
    %47 = math.tanh %46 : vector<8x64xf32>
    %48 = arith.index_cast %c1_i32 : i32 to index
    %c0_33 = arith.constant 0 : index
    %c0_34 = arith.constant 0 : index
    %49 = vector.load %arg16[%48, %c0_33, %c0_34] : memref<8x8x64xf32, #tpu.memory_space<vmem>>, vector<1x8x64xf32>
    %50 = vector.shape_cast %49 : vector<1x8x64xf32> to vector<8x64xf32>
    %51 = vector.shape_cast %47 : vector<8x64xf32> to vector<1x8x64xf32>
    tpu.vector_store %arg16[%48, %c0_33, %c0_34], %51 {strides = array<i32>} : memref<8x8x64xf32, #tpu.memory_space<vmem>>, vector<1x8x64xf32>,
    %cst_35 = arith.constant dense<0.000000e+00> : vector<8x8xf32>
    %52 = tpu.matmul %47, %4, %cst_35 {dimension_numbers = #tpu.dot_dimension_numbers<[1], [0], [0], [1], [0, 0, 1, 1], [], []>} : vector<8x64xf32>, vector<64x8xf32>, vector<8x8xf32> -> vector<8x8xf32>
    %53 = arith.addf %52, %7 : vector<8x8xf32>
    %54 = vector.broadcast %cst_18 : f32 to vector<8x8xf32>
    %55 = arith.mulf %54, %53 : vector<8x8xf32>
    %56 = arith.addf %37, %55 : vector<8x8xf32>
    %c2_i32 = arith.constant 2 : i32
    %57 = arith.index_cast %c2_i32 : i32 to index
    %c0_36 = arith.constant 0 : index
    %c0_37 = arith.constant 0 : index
    %58 = vector.load %arg14[%57, %c0_36, %c0_37] : memref<8x8x8xf32, #tpu.memory_space<vmem>>, vector<1x8x8xf32>
    %59 = vector.shape_cast %58 : vector<1x8x8xf32> to vector<8x8xf32>
    %60 = vector.shape_cast %56 : vector<8x8xf32> to vector<1x8x8xf32>
    tpu.vector_store %arg14[%57, %c0_36, %c0_37], %60 {strides = array<i32>} : memref<8x8x8xf32, #tpu.memory_space<vmem>>, vector<1x8x8xf32>,
    %cst_38 = arith.constant dense<0.000000e+00> : vector<8x64xf32>
    %61 = tpu.matmul %56, %3, %cst_38 {dimension_numbers = #tpu.dot_dimension_numbers<[1], [0], [0], [1], [0, 0, 1, 1], [], []>} : vector<8x8xf32>, vector<8x64xf32>, vector<8x64xf32> -> vector<8x64xf32>
    %62 = arith.index_cast %c2_i32 : i32 to index
    %c0_39 = arith.constant 0 : index
    %c0_40 = arith.constant 0 : index
    %63 = vector.load %arg16[%62, %c0_39, %c0_40] : memref<8x8x64xf32, #tpu.memory_space<vmem>>, vector<1x8x64xf32>
    %64 = vector.shape_cast %63 : vector<1x8x64xf32> to vector<8x64xf32>
    %65 = arith.addf %61, %64 : vector<8x64xf32>
    %66 = math.tanh %65 : vector<8x64xf32>
    %67 = arith.index_cast %c2_i32 : i32 to index
    %c0_41 = arith.constant 0 : index
    %c0_42 = arith.constant 0 : index
    %68 = vector.load %arg16[%67, %c0_41, %c0_42] : memref<8x8x64xf32, #tpu.memory_space<vmem>>, vector<1x8x64xf32>
    %69 = vector.shape_cast %68 : vector<1x8x64xf32> to vector<8x64xf32>
    %70 = vector.shape_cast %66 : vector<8x64xf32> to vector<1x8x64xf32>
    tpu.vector_store %arg16[%67, %c0_41, %c0_42], %70 {strides = array<i32>} : memref<8x8x64xf32, #tpu.memory_space<vmem>>, vector<1x8x64xf32>,
    %cst_43 = arith.constant dense<0.000000e+00> : vector<8x8xf32>
    %71 = tpu.matmul %66, %4, %cst_43 {dimension_numbers = #tpu.dot_dimension_numbers<[1], [0], [0], [1], [0, 0, 1, 1], [], []>} : vector<8x64xf32>, vector<64x8xf32>, vector<8x8xf32> -> vector<8x8xf32>
    %72 = arith.addf %71, %7 : vector<8x8xf32>
    %73 = vector.broadcast %cst_18 : f32 to vector<8x8xf32>
    %74 = arith.mulf %73, %72 : vector<8x8xf32>
    %75 = arith.addf %56, %74 : vector<8x8xf32>
    %c3_i32 = arith.constant 3 : i32
    %76 = arith.index_cast %c3_i32 : i32 to index
    %c0_44 = arith.constant 0 : index
    %c0_45 = arith.constant 0 : index
    %77 = vector.load %arg14[%76, %c0_44, %c0_45] : memref<8x8x8xf32, #tpu.memory_space<vmem>>, vector<1x8x8xf32>
    %78 = vector.shape_cast %77 : vector<1x8x8xf32> to vector<8x8xf32>
    %79 = vector.shape_cast %75 : vector<8x8xf32> to vector<1x8x8xf32>
    tpu.vector_store %arg14[%76, %c0_44, %c0_45], %79 {strides = array<i32>} : memref<8x8x8xf32, #tpu.memory_space<vmem>>, vector<1x8x8xf32>,
    %cst_46 = arith.constant dense<0.000000e+00> : vector<8x64xf32>
    %80 = tpu.matmul %75, %3, %cst_46 {dimension_numbers = #tpu.dot_dimension_numbers<[1], [0], [0], [1], [0, 0, 1, 1], [], []>} : vector<8x8xf32>, vector<8x64xf32>, vector<8x64xf32> -> vector<8x64xf32>
    %81 = arith.index_cast %c3_i32 : i32 to index
    %c0_47 = arith.constant 0 : index
    %c0_48 = arith.constant 0 : index
    %82 = vector.load %arg16[%81, %c0_47, %c0_48] : memref<8x8x64xf32, #tpu.memory_space<vmem>>, vector<1x8x64xf32>
    %83 = vector.shape_cast %82 : vector<1x8x64xf32> to vector<8x64xf32>
    %84 = arith.addf %80, %83 : vector<8x64xf32>
    %85 = math.tanh %84 : vector<8x64xf32>
    %86 = arith.index_cast %c3_i32 : i32 to index
    %c0_49 = arith.constant 0 : index
    %c0_50 = arith.constant 0 : index
    %87 = vector.load %arg16[%86, %c0_49, %c0_50] : memref<8x8x64xf32, #tpu.memory_space<vmem>>, vector<1x8x64xf32>
    %88 = vector.shape_cast %87 : vector<1x8x64xf32> to vector<8x64xf32>
    %89 = vector.shape_cast %85 : vector<8x64xf32> to vector<1x8x64xf32>
    tpu.vector_store %arg16[%86, %c0_49, %c0_50], %89 {strides = array<i32>} : memref<8x8x64xf32, #tpu.memory_space<vmem>>, vector<1x8x64xf32>,
    %cst_51 = arith.constant dense<0.000000e+00> : vector<8x8xf32>
    %90 = tpu.matmul %85, %4, %cst_51 {dimension_numbers = #tpu.dot_dimension_numbers<[1], [0], [0], [1], [0, 0, 1, 1], [], []>} : vector<8x64xf32>, vector<64x8xf32>, vector<8x8xf32> -> vector<8x8xf32>
    %91 = arith.addf %90, %7 : vector<8x8xf32>
    %92 = vector.broadcast %cst_18 : f32 to vector<8x8xf32>
    %93 = arith.mulf %92, %91 : vector<8x8xf32>
    %94 = arith.addf %75, %93 : vector<8x8xf32>
    %c4_i32 = arith.constant 4 : i32
    %95 = arith.index_cast %c4_i32 : i32 to index
    %c0_52 = arith.constant 0 : index
    %c0_53 = arith.constant 0 : index
    %96 = vector.load %arg14[%95, %c0_52, %c0_53] : memref<8x8x8xf32, #tpu.memory_space<vmem>>, vector<1x8x8xf32>
    %97 = vector.shape_cast %96 : vector<1x8x8xf32> to vector<8x8xf32>
    %98 = vector.shape_cast %94 : vector<8x8xf32> to vector<1x8x8xf32>
    tpu.vector_store %arg14[%95, %c0_52, %c0_53], %98 {strides = array<i32>} : memref<8x8x8xf32, #tpu.memory_space<vmem>>, vector<1x8x8xf32>,
    %cst_54 = arith.constant dense<0.000000e+00> : vector<8x64xf32>
    %99 = tpu.matmul %94, %3, %cst_54 {dimension_numbers = #tpu.dot_dimension_numbers<[1], [0], [0], [1], [0, 0, 1, 1], [], []>} : vector<8x8xf32>, vector<8x64xf32>, vector<8x64xf32> -> vector<8x64xf32>
    %100 = arith.index_cast %c4_i32 : i32 to index
    %c0_55 = arith.constant 0 : index
    %c0_56 = arith.constant 0 : index
    %101 = vector.load %arg16[%100, %c0_55, %c0_56] : memref<8x8x64xf32, #tpu.memory_space<vmem>>, vector<1x8x64xf32>
    %102 = vector.shape_cast %101 : vector<1x8x64xf32> to vector<8x64xf32>
    %103 = arith.addf %99, %102 : vector<8x64xf32>
    %104 = math.tanh %103 : vector<8x64xf32>
    %105 = arith.index_cast %c4_i32 : i32 to index
    %c0_57 = arith.constant 0 : index
    %c0_58 = arith.constant 0 : index
    %106 = vector.load %arg16[%105, %c0_57, %c0_58] : memref<8x8x64xf32, #tpu.memory_space<vmem>>, vector<1x8x64xf32>
    %107 = vector.shape_cast %106 : vector<1x8x64xf32> to vector<8x64xf32>
    %108 = vector.shape_cast %104 : vector<8x64xf32> to vector<1x8x64xf32>
    tpu.vector_store %arg16[%105, %c0_57, %c0_58], %108 {strides = array<i32>} : memref<8x8x64xf32, #tpu.memory_space<vmem>>, vector<1x8x64xf32>,
    %cst_59 = arith.constant dense<0.000000e+00> : vector<8x8xf32>
    %109 = tpu.matmul %104, %4, %cst_59 {dimension_numbers = #tpu.dot_dimension_numbers<[1], [0], [0], [1], [0, 0, 1, 1], [], []>} : vector<8x64xf32>, vector<64x8xf32>, vector<8x8xf32> -> vector<8x8xf32>
    %110 = arith.addf %109, %7 : vector<8x8xf32>
    %111 = vector.broadcast %cst_18 : f32 to vector<8x8xf32>
    %112 = arith.mulf %111, %110 : vector<8x8xf32>
    %113 = arith.addf %94, %112 : vector<8x8xf32>
    %c5_i32 = arith.constant 5 : i32
    %114 = arith.index_cast %c5_i32 : i32 to index
    %c0_60 = arith.constant 0 : index
    %c0_61 = arith.constant 0 : index
    %115 = vector.load %arg14[%114, %c0_60, %c0_61] : memref<8x8x8xf32, #tpu.memory_space<vmem>>, vector<1x8x8xf32>
    %116 = vector.shape_cast %115 : vector<1x8x8xf32> to vector<8x8xf32>
    %117 = vector.shape_cast %113 : vector<8x8xf32> to vector<1x8x8xf32>
    tpu.vector_store %arg14[%114, %c0_60, %c0_61], %117 {strides = array<i32>} : memref<8x8x8xf32, #tpu.memory_space<vmem>>, vector<1x8x8xf32>,
    %cst_62 = arith.constant dense<0.000000e+00> : vector<8x64xf32>
    %118 = tpu.matmul %113, %3, %cst_62 {dimension_numbers = #tpu.dot_dimension_numbers<[1], [0], [0], [1], [0, 0, 1, 1], [], []>} : vector<8x8xf32>, vector<8x64xf32>, vector<8x64xf32> -> vector<8x64xf32>
    %119 = arith.index_cast %c5_i32 : i32 to index
    %c0_63 = arith.constant 0 : index
    %c0_64 = arith.constant 0 : index
    %120 = vector.load %arg16[%119, %c0_63, %c0_64] : memref<8x8x64xf32, #tpu.memory_space<vmem>>, vector<1x8x64xf32>
    %121 = vector.shape_cast %120 : vector<1x8x64xf32> to vector<8x64xf32>
    %122 = arith.addf %118, %121 : vector<8x64xf32>
    %123 = math.tanh %122 : vector<8x64xf32>
    %124 = arith.index_cast %c5_i32 : i32 to index
    %c0_65 = arith.constant 0 : index
    %c0_66 = arith.constant 0 : index
    %125 = vector.load %arg16[%124, %c0_65, %c0_66] : memref<8x8x64xf32, #tpu.memory_space<vmem>>, vector<1x8x64xf32>
    %126 = vector.shape_cast %125 : vector<1x8x64xf32> to vector<8x64xf32>
    %127 = vector.shape_cast %123 : vector<8x64xf32> to vector<1x8x64xf32>
    tpu.vector_store %arg16[%124, %c0_65, %c0_66], %127 {strides = array<i32>} : memref<8x8x64xf32, #tpu.memory_space<vmem>>, vector<1x8x64xf32>,
    %cst_67 = arith.constant dense<0.000000e+00> : vector<8x8xf32>
    %128 = tpu.matmul %123, %4, %cst_67 {dimension_numbers = #tpu.dot_dimension_numbers<[1], [0], [0], [1], [0, 0, 1, 1], [], []>} : vector<8x64xf32>, vector<64x8xf32>, vector<8x8xf32> -> vector<8x8xf32>
    %129 = arith.addf %128, %7 : vector<8x8xf32>
    %130 = vector.broadcast %cst_18 : f32 to vector<8x8xf32>
    %131 = arith.mulf %130, %129 : vector<8x8xf32>
    %132 = arith.addf %113, %131 : vector<8x8xf32>
    %c6_i32 = arith.constant 6 : i32
    %133 = arith.index_cast %c6_i32 : i32 to index
    %c0_68 = arith.constant 0 : index
    %c0_69 = arith.constant 0 : index
    %134 = vector.load %arg14[%133, %c0_68, %c0_69] : memref<8x8x8xf32, #tpu.memory_space<vmem>>, vector<1x8x8xf32>
    %135 = vector.shape_cast %134 : vector<1x8x8xf32> to vector<8x8xf32>
    %136 = vector.shape_cast %132 : vector<8x8xf32> to vector<1x8x8xf32>
    tpu.vector_store %arg14[%133, %c0_68, %c0_69], %136 {strides = array<i32>} : memref<8x8x8xf32, #tpu.memory_space<vmem>>, vector<1x8x8xf32>,
    %cst_70 = arith.constant dense<0.000000e+00> : vector<8x64xf32>
    %137 = tpu.matmul %132, %3, %cst_70 {dimension_numbers = #tpu.dot_dimension_numbers<[1], [0], [0], [1], [0, 0, 1, 1], [], []>} : vector<8x8xf32>, vector<8x64xf32>, vector<8x64xf32> -> vector<8x64xf32>
    %138 = arith.index_cast %c6_i32 : i32 to index
    %c0_71 = arith.constant 0 : index
    %c0_72 = arith.constant 0 : index
    %139 = vector.load %arg16[%138, %c0_71, %c0_72] : memref<8x8x64xf32, #tpu.memory_space<vmem>>, vector<1x8x64xf32>
    %140 = vector.shape_cast %139 : vector<1x8x64xf32> to vector<8x64xf32>
    %141 = arith.addf %137, %140 : vector<8x64xf32>
    %142 = math.tanh %141 : vector<8x64xf32>
    %143 = arith.index_cast %c6_i32 : i32 to index
    %c0_73 = arith.constant 0 : index
    %c0_74 = arith.constant 0 : index
    %144 = vector.load %arg16[%143, %c0_73, %c0_74] : memref<8x8x64xf32, #tpu.memory_space<vmem>>, vector<1x8x64xf32>
    %145 = vector.shape_cast %144 : vector<1x8x64xf32> to vector<8x64xf32>
    %146 = vector.shape_cast %142 : vector<8x64xf32> to vector<1x8x64xf32>
    tpu.vector_store %arg16[%143, %c0_73, %c0_74], %146 {strides = array<i32>} : memref<8x8x64xf32, #tpu.memory_space<vmem>>, vector<1x8x64xf32>,
    %cst_75 = arith.constant dense<0.000000e+00> : vector<8x8xf32>
    %147 = tpu.matmul %142, %4, %cst_75 {dimension_numbers = #tpu.dot_dimension_numbers<[1], [0], [0], [1], [0, 0, 1, 1], [], []>} : vector<8x64xf32>, vector<64x8xf32>, vector<8x8xf32> -> vector<8x8xf32>
    %148 = arith.addf %147, %7 : vector<8x8xf32>
    %149 = vector.broadcast %cst_18 : f32 to vector<8x8xf32>
    %150 = arith.mulf %149, %148 : vector<8x8xf32>
    %151 = arith.addf %132, %150 : vector<8x8xf32>
    %c7_i32 = arith.constant 7 : i32
    %152 = arith.index_cast %c7_i32 : i32 to index
    %c0_76 = arith.constant 0 : index
    %c0_77 = arith.constant 0 : index
    %153 = vector.load %arg14[%152, %c0_76, %c0_77] : memref<8x8x8xf32, #tpu.memory_space<vmem>>, vector<1x8x8xf32>
    %154 = vector.shape_cast %153 : vector<1x8x8xf32> to vector<8x8xf32>
    %155 = vector.shape_cast %151 : vector<8x8xf32> to vector<1x8x8xf32>
    tpu.vector_store %arg14[%152, %c0_76, %c0_77], %155 {strides = array<i32>} : memref<8x8x8xf32, #tpu.memory_space<vmem>>, vector<1x8x8xf32>,
    %cst_78 = arith.constant dense<0.000000e+00> : vector<8x64xf32>
    %156 = tpu.matmul %151, %3, %cst_78 {dimension_numbers = #tpu.dot_dimension_numbers<[1], [0], [0], [1], [0, 0, 1, 1], [], []>} : vector<8x8xf32>, vector<8x64xf32>, vector<8x64xf32> -> vector<8x64xf32>
    %157 = arith.index_cast %c7_i32 : i32 to index
    %c0_79 = arith.constant 0 : index
    %c0_80 = arith.constant 0 : index
    %158 = vector.load %arg16[%157, %c0_79, %c0_80] : memref<8x8x64xf32, #tpu.memory_space<vmem>>, vector<1x8x64xf32>
    %159 = vector.shape_cast %158 : vector<1x8x64xf32> to vector<8x64xf32>
    %160 = arith.addf %156, %159 : vector<8x64xf32>
    %161 = math.tanh %160 : vector<8x64xf32>
    %162 = arith.index_cast %c7_i32 : i32 to index
    %c0_81 = arith.constant 0 : index
    %c0_82 = arith.constant 0 : index
    %163 = vector.load %arg16[%162, %c0_81, %c0_82] : memref<8x8x64xf32, #tpu.memory_space<vmem>>, vector<1x8x64xf32>
    %164 = vector.shape_cast %163 : vector<1x8x64xf32> to vector<8x64xf32>
    %165 = vector.shape_cast %161 : vector<8x64xf32> to vector<1x8x64xf32>
    tpu.vector_store %arg16[%162, %c0_81, %c0_82], %165 {strides = array<i32>} : memref<8x8x64xf32, #tpu.memory_space<vmem>>, vector<1x8x64xf32>,
    %cst_83 = arith.constant dense<0.000000e+00> : vector<8x8xf32>
    %166 = tpu.matmul %161, %4, %cst_83 {dimension_numbers = #tpu.dot_dimension_numbers<[1], [0], [0], [1], [0, 0, 1, 1], [], []>} : vector<8x64xf32>, vector<64x8xf32>, vector<8x8xf32> -> vector<8x8xf32>
    %167 = arith.addf %166, %7 : vector<8x8xf32>
    %168 = vector.broadcast %cst_18 : f32 to vector<8x8xf32>
    %169 = arith.mulf %168, %167 : vector<8x8xf32>
    %170 = arith.addf %151, %169 : vector<8x8xf32>
    %c8_i32 = arith.constant 8 : i32
    %c0_84 = arith.constant 0 : index
    %c0_85 = arith.constant 0 : index
    %171 = vector.load %arg15[%c0_84, %c0_85] : memref<8x8xf32, #tpu.memory_space<vmem>>, vector<8x8xf32>
    tpu.vector_store %arg15[%c0_84, %c0_85], %170 {strides = array<i32>} : memref<8x8xf32, #tpu.memory_space<vmem>>, vector<8x8xf32>,
    %c0_86 = arith.constant 0 : index
    %c0_87 = arith.constant 0 : index
    %c0_88 = arith.constant 0 : index
    %172 = vector.load %arg16[%c0_86, %c0_87, %c0_88] : memref<8x8x64xf32, #tpu.memory_space<vmem>>, vector<8x8x64xf32>
    %173 = vector.shape_cast %172 : vector<8x8x64xf32> to vector<64x64xf32>
    %c0_89 = arith.constant 0 : index
    %c0_90 = arith.constant 0 : index
    %174 = vector.load %arg11[%c0_89, %c0_90] : memref<64x2xf32, #tpu.memory_space<vmem>>, vector<64x2xf32>
    %cst_91 = arith.constant dense<0.000000e+00> : vector<64x2xf32>
    %175 = tpu.matmul %173, %174, %cst_91 {dimension_numbers = #tpu.dot_dimension_numbers<[1], [0], [0], [1], [0, 0, 1, 1], [], []>} : vector<64x64xf32>, vector<64x2xf32>, vector<64x2xf32> -> vector<64x2xf32>
    %c0_92 = arith.constant 0 : index
    %c0_93 = arith.constant 0 : index
    %176 = vector.load %arg12[%c0_92, %c0_93] : memref<1x2xf32, #tpu.memory_space<vmem>>, vector<1x2xf32>
    %177 = vector.shape_cast %176 : vector<1x2xf32> to vector<1x2xf32>
    %178 = vector.broadcast %177 : vector<1x2xf32> to vector<64x2xf32>
    %179 = arith.addf %175, %178 : vector<64x2xf32>
    %180 = vector.shape_cast %179 : vector<64x2xf32> to vector<8x8x2xf32>
    %c0_94 = arith.constant 0 : index
    %c0_95 = arith.constant 0 : index
    %c0_96 = arith.constant 0 : index
    %181 = vector.load %arg13[%c0_94, %c0_95, %c0_96] : memref<8x8x2xf32, #tpu.memory_space<vmem>>, vector<8x8x2xf32>
    tpu.vector_store %arg13[%c0_94, %c0_95, %c0_96], %180 {strides = array<i32>} : memref<8x8x2xf32, #tpu.memory_space<vmem>>, vector<8x8x2xf32>,
    return
  }
  func.func @transform_0(%arg0: i32) -> (i32, i32, i32) {
    %c0_i32 = arith.constant 0 : i32
    %c0_i32_0 = arith.constant 0 : i32
    %c0_i32_1 = arith.constant 0 : i32
    return %arg0, %c0_i32, %c0_i32_0 : i32, i32, i32
  }
  func.func @transform_1(%arg0: i32) -> (i32, i32) {
    %c0_i32 = arith.constant 0 : i32
    %c0_i32_0 = arith.constant 0 : i32
    %c0_i32_1 = arith.constant 0 : i32
    return %c0_i32, %c0_i32_0 : i32, i32
  }
  func.func @transform_2(%arg0: i32) -> (i32, i32) {
    %c0_i32 = arith.constant 0 : i32
    %c0_i32_0 = arith.constant 0 : i32
    %c0_i32_1 = arith.constant 0 : i32
    return %c0_i32, %c0_i32_0 : i32, i32
  }
  func.func @transform_3(%arg0: i32) -> (i32, i32) {
    %c0_i32 = arith.constant 0 : i32
    %c0_i32_0 = arith.constant 0 : i32
    %c0_i32_1 = arith.constant 0 : i32
    return %c0_i32, %c0_i32_0 : i32, i32
  }
  func.func @transform_4(%arg0: i32) -> (i32, i32) {
    %c0_i32 = arith.constant 0 : i32
    %c0_i32_0 = arith.constant 0 : i32
    %c0_i32_1 = arith.constant 0 : i32
    return %c0_i32, %c0_i32_0 : i32, i32
  }
  func.func @transform_5(%arg0: i32) -> (i32, i32) {
    %c0_i32 = arith.constant 0 : i32
    %c0_i32_0 = arith.constant 0 : i32
    %c0_i32_1 = arith.constant 0 : i32
    return %c0_i32, %c0_i32_0 : i32, i32
  }
  func.func @transform_6(%arg0: i32) -> (i32, i32) {
    %c0_i32 = arith.constant 0 : i32
    %c0_i32_0 = arith.constant 0 : i32
    %c0_i32_1 = arith.constant 0 : i32
    return %c0_i32, %c0_i32_0 : i32, i32
  }
  func.func @transform_7(%arg0: i32) -> (i32, i32) {
    %c0_i32 = arith.constant 0 : i32
    %c0_i32_0 = arith.constant 0 : i32
    %c0_i32_1 = arith.constant 0 : i32
    return %c0_i32, %c0_i32_0 : i32, i32
  }
  func.func @transform_8(%arg0: i32) -> (i32, i32) {
    %c0_i32 = arith.constant 0 : i32
    %c0_i32_0 = arith.constant 0 : i32
    %c0_i32_1 = arith.constant 0 : i32
    return %c0_i32, %c0_i32_0 : i32, i32
  }
  func.func @transform_9(%arg0: i32) -> (i32, i32) {
    %c0_i32 = arith.constant 0 : i32
    %c0_i32_0 = arith.constant 0 : i32
    %c0_i32_1 = arith.constant 0 : i32
    return %c0_i32, %c0_i32_0 : i32, i32
  }
  func.func @transform_10(%arg0: i32) -> (i32, i32) {
    %c0_i32 = arith.constant 0 : i32
    %c0_i32_0 = arith.constant 0 : i32
    %c0_i32_1 = arith.constant 0 : i32
    return %c0_i32, %c0_i32_0 : i32, i32
  }
  func.func @transform_11(%arg0: i32) -> (i32, i32) {
    %c0_i32 = arith.constant 0 : i32
    %c0_i32_0 = arith.constant 0 : i32
    %c0_i32_1 = arith.constant 0 : i32
    return %c0_i32, %c0_i32_0 : i32, i32
  }
  func.func @transform_12(%arg0: i32) -> (i32, i32, i32) {
    %c0_i32 = arith.constant 0 : i32
    %c0_i32_0 = arith.constant 0 : i32
    %c0_i32_1 = arith.constant 0 : i32
    return %arg0, %c0_i32, %c0_i32_0 : i32, i32, i32
  }
  func.func @transform_13(%arg0: i32) -> (i32, i32, i32) {
    %c0_i32 = arith.constant 0 : i32
    %c0_i32_0 = arith.constant 0 : i32
    %c0_i32_1 = arith.constant 0 : i32
    return %arg0, %c0_i32, %c0_i32_0 : i32, i32, i32
  }
}

</mosaic_0001>

<bundles_post_ra>
// kernel: tpu_custom_call.1
= control target key start
LH: loop header
LB: loop body
LE: loop exit
PB: predicated region body
PF: predicated region fallthrough
CT: control target
= control target key end

     0   :  { %vm61_vm0 = vcmask 1043456   ;;  %v2389_v2 = vmov 0.0   ;;  %vm2390_vm1 = vmmov 0   ;;  %vm57_vm2 = vcmask 31744   ;;  %s2838_s0 = inlined_call_operand.vmem [shape: f32[8,8,4], index: 0, kind: input, shape index: {}]   ;;  %s2839_s1 = inlined_call_operand.vmem [shape: f32[4,32], index: 1, kind: input, shape index: {}]   ;;  %s2840_s2 = inlined_call_operand.vmem [shape: f32[1,32], index: 2, kind: input, shape index: {}]   ;;  %s2841_s3 = inlined_call_operand.vmem [shape: f32[32,8], index: 3, kind: input, shape index: {}]   ;;  %s2842_s4 = inlined_call_operand.vmem [shape: f32[1,8], index: 4, kind: input, shape index: {}]   ;;  %s2843_s5 = inlined_call_operand.vmem [shape: f32[8,64], index: 5, kind: input, shape index: {}]   ;;  %s2844_s6 = inlined_call_operand.vmem [shape: f32[4,64], index: 6, kind: input, shape index: {}]   ;;  %s2845_s7 = inlined_call_operand.vmem [shape: f32[1,64], index: 7, kind: input, shape index: {}]   ;;  %s2846_s8 = inlined_call_operand.vmem [shape: f32[64,8], index: 8, kind: input, shape index: {}]   ;;  %s2847_s9 = inlined_call_operand.vmem [shape: f32[1,8], index: 9, kind: input, shape index: {}]   ;;  %s2848_s10 = inlined_call_operand.vmem [shape: f32[64,2], index: 10, kind: input, shape index: {}]   ;;  %s2849_s11 = inlined_call_operand.vmem [shape: f32[1,2], index: 11, kind: input, shape index: {}]   ;;  %s2850_s12 = inlined_call_operand.vmem [shape: f32[8,8,2], index: 12, kind: output, shape index: {0}]   ;;  %s2851_s13 = inlined_call_operand.hbm [shape: f32[8,8,8], index: 13, kind: output, shape index: {1}]  }
   0x1   :  { %v49_v0 = vld [vmem:[%s2839_s1] sm:$0xf]  ;;  %1973 = vmatprep.subr.mxu1 %v2389_v2  ;;  %1975 = vmatprep.mubr.msk.f32.mxu1 %vm2390_vm1, %v2389_v2 }
   0x2   :  { %v48_v1 = vld [vmem:[%s2838_s0] sm:$0xff] }
   0x3   :  { %19 = vsyncpa [#allocation5], 0  ;;  %1974 = vmatpush3.msk.msra.mxu1 %vm61_vm0, %v49_v0  ;;  %1991 = vmatprep.mubr.msk.f32.mxu0 %vm57_vm2, %v48_v1  ;;  %v136_v3 = vld [vmem:[%s2841_s3] sm:$0xff]  ;;  %v137_v4 = vld [vmem:[%s2841_s3 + $0x8] sm:$0xff]  ;;  %v2391_v6 = vmov 0.0|0.0   ;;  %vm147_vm3 = vcmask 261120  }
   0x4   :  { %1976 = vmatmul.mubr.msk.f32.vlgmr.msra.gmra.mrb[0].mxu1 %vm57_vm2, %v48_v1  ;;  %v138_v5 = vld [vmem:[%s2841_s3 + $0x10] sm:$0xff]  ;;  %2223 = vmatprep.subr.bf16.mxu1 %v2391_v6  ;;  %v2224_v7 = vpack.c.bf16 %v137_v4, %v136_v3  ;;  %v139_v8 = vld [vmem:[%s2841_s3 + $0x18] sm:$0xff]  ;;  %v247_v10 = vld [vmem:[%s2844_s6] sm:$0xf]  ;;  %vm389_vm4 = vcmask 523264   ;;  %vm221_vm5 = vcmask 64512  }
   0x5   :  { %1986 = vmatprep.mubr.msk.f32.mxu1 %vm2390_vm1, %v2389_v2  ;;  %v2227_v9 = vpack.c.bf16 %v139_v8, %v138_v5  ;;  %v240_v11 = vld [vmem:[%s2838_s0 + $0x8] sm:$0xff]  ;;  %1989 = vmatprep.subr.msk.mxu0 %vm61_vm0, %v247_v10  ;;  %v1812_v12 = vld [vmem:[%s2840_s2] ss:$0 sm:$0xff]  ;;  %v241_v25 = vld [vmem:[%s2838_s0 + $0x10] sm:$0xff]  ;;  %vm1783_vm6 = vcmask 15360  }
   0x6   :  { %2225 = vmatpush3.bf16.msra.mxu1 %v2224_v7  ;;  %1990 = vmatpush3.msk.msra.mxu0 %vm61_vm0, %v247_v10  ;;  %v2512_v17 = vld [vmem:[%s2843_s5] sm:$0xff]  ;;  %v225_v21 = vld [vmem:[%s2846_s8 + $0x8] sm:$0xff]  ;;  %v242_v32 = vld [vmem:[%s2838_s0 + $0x18] sm:$0xff] }
   0x7   :  { %2226 = vmatprep.subr.bf16.mxu1 %v2391_v6  ;;  %1992 = vmatmul.mubr.msk.f32.vlgmr.msra.gmra.mrb[0].mxu0 %vm57_vm2, %v240_v11  ;;  %v2519_v19 = vld [vmem:[%s2845_s7] ss:$0 sm:$0xff]  ;;  %v226_v33 = vld [vmem:[%s2846_s8 + $0x10] sm:$0xff]  ;;  %v227_v34 = vld [vmem:[%s2846_s8 + $0x18] sm:$0xff]  ;;  %s2392_s7 = smov [#allocation4]  }
   0x8   :  { %2229 = vmatprep.subr.bf16.mxu0 %v2391_v6  ;;  %v224_v20 = vld [vmem:[%s2846_s8] sm:$0xff]  ;;  %1994 = vmatprep.mubr.msk.f32.mxu0 %vm57_vm2, %v241_v25  ;;  %v2563_v35 = vpack.c.bf16 %v227_v34, %v226_v33  ;;  %v244_v37 = vld [vmem:[%s2838_s0 + $0x28] sm:$0xff]  ;;  %v245_v41 = vld [vmem:[%s2838_s0 + $0x30] sm:$0xff]  ;;  %s1799_s30 = sshll.u32 %s2392_s7, 4  ;;  %s1800_s30 = int_to_ptr.vmem [resolvable:$true] %s1799_s30 }
   0x9   :  { %v2528_v24 = vpack.c.bf16 %v225_v21, %v224_v20  ;;  %v1815_v27 = vld [vmem:[%s2842_s4] ss:$0 sm:$0xff]  ;;  %v229_v39 = vld [vmem:[%s2846_s8 + $0x28] sm:$0xff]  ;;  %v246_v42 = vld [vmem:[%s2838_s0 + $0x38] sm:$0xff]  ;;  %s2365_s4 = scalar_lea.vmem %s1800_s30, 1024  ;;  %p2370_p1 = scmp.lt.s32.totalorder %s1800_s30, %s1800_s30 }
   0xa   :  { %2228 = vmatpush3.bf16.msra.mxu1 %v2227_v9  ;;  %v243_v36 = vld [vmem:[%s2838_s0 + $0x20] sm:$0xff]  ;;  %v230_v43 = vld [vmem:[%s2846_s8 + $0x30] sm:$0xff]  ;;  %v231_v44 = vld [vmem:[%s2846_s8 + $0x38] sm:$0xff]  ;;  %p2366_p0 = scmp.ne.s32.totalorder %s1800_s30, %s2365_s4  ;;  %p2371_p2 = scmp.lt.s32.totalorder %s2365_s4, %s2365_s4 }
   0xb   :  { %2003 = vmatprep.subr.mxu1 %v2389_v2  ;;  %2231 = vmatpush3.bf16.msra.mxu0 %v2528_v24  ;;  %v228_v38 = vld [vmem:[%s2846_s8 + $0x20] sm:$0xff]  ;;  %v2599_v45 = vpack.c.bf16 %v231_v44, %v230_v43 }
   0xc   :  { %2232 = vmatprep.subr.bf16.mxu0 %v2391_v6  ;;  %1995 = vmatmul.mubr.msk.f32.gmra.mrb[2].mxu0 %vm57_vm2, %v242_v32  ;;  %v2581_v40 = vpack.c.bf16 %v229_v39, %v228_v38  ;;  %v2632_v63 = vld [vmem:[%s2847_s9] ss:$0 sm:$0xff]  ;;  %p2372_p3 = por %p2371_p2, %p2370_p1 }
   0xd   :  { %1997 = vmatprep.mubr.msk.f32.mxu0 %vm57_vm2, %v243_v36 }
   0xe   :  { %p2373_p4 = pnand %p2372_p3, %p2366_p0 }
   0xf   :  { %2234 = vmatpush3.bf16.msra.mxu0 %v2563_v35 }
  0x10   :  { %2235 = vmatprep.subr.bf16.mxu0 %v2391_v6  ;;  %1998 = vmatmul.mubr.msk.f32.gmra.mrb[4].mxu0 %vm57_vm2, %v244_v37 }
  0x11   :  { %2000 = vmatprep.mubr.msk.f32.mxu0 %vm57_vm2, %v245_v41 }
  0x13   :  { %2237 = vmatpush3.bf16.msra.mxu0 %v2581_v40 }
  0x14   :  { %2238 = vmatprep.subr.bf16.mxu0 %v2391_v6  ;;  %2001 = vmatmul.mubr.msk.f32.gmra.mrb[6].mxu0 %vm57_vm2, %v246_v42 }
  0x15   :  { %2024 = vmatprep.mubr.msk.f32.mxu0 %vm2390_vm1, %v2389_v2 }
  0x17   :  { %2240 = vmatpush3.bf16.msra.mxu0 %v2599_v45 }
  0x18   :  { %2253 = vmatprep.subr.bf16.mxu0 %v2391_v6 }
  0xd7   :  { %v131_v13 = vpop.f32.mrb[0].mxu1 }
  0xd8   :  { %v132_v14 = vadd.f32 %v1812_v12, %v131_v13  ;;  %v1977_v15 = vpop.f32.mrb[1].mxu1 }
  0xda   :  { %2347 = vtanh.f32 %v132_v14  ;;  %v1993_v18 = vpop.f32.mrb[0].mxu0 }
  0xdb   :  { %v356_v22 = vadd.f32 %v1993_v18, %v2519_v19  ;;  %v350_v23 = vpop.f32.mrb[1].mxu0 }
  0xdc   :  { %v351_v26 = vadd.f32 %v2519_v19, %v350_v23 }
  0xdd   :  { %391 = vst.msk [vmem:[#allocation3 + $0x8] sm:$0xff] %vm389_vm4, %v356_v22 }
  0xde   :  { %390 = vst.msk [vmem:[#allocation3] sm:$0xff] %vm389_vm4, %v351_v26 }
  0xdf   :  { %v1996_v51 = vpop.f32.mrb[2].mxu0 }
  0xe0   :  { %v366_v52 = vadd.f32 %v1996_v51, %v2519_v19  ;;  %v360_v53 = vpop.f32.mrb[3].mxu0 }
  0xe1   :  { %v361_v54 = vadd.f32 %v2519_v19, %v360_v53 }
  0xe2   :  { %393 = vst.msk [vmem:[#allocation3 + $0x18] sm:$0xff] %vm389_vm4, %v366_v52 }
  0xe3   :  { %392 = vst.msk [vmem:[#allocation3 + $0x10] sm:$0xff] %vm389_vm4, %v361_v54  ;;  %v1999_v55 = vpop.f32.mrb[4].mxu0 }
  0xe4   :  { %v2348_v16 = vpop.eup %2347  ;;  %v376_v56 = vadd.f32 %v1999_v55, %v2519_v19  ;;  %v370_v57 = vpop.f32.mrb[5].mxu0  ;;  %v555_v7 = vld [vmem:[#allocation3 + $0x8] sm:$0xff] }
  0xe5   :  { %1987 = vmatmul.mubr.msk.f32.vlgmr.msra.gmra.mrb[2].mxu1 %vm147_vm3, %v2348_v16  ;;  %v401_v46 = vld [vmem:[#allocation3] sm:$0xff]  ;;  %v371_v58 = vadd.f32 %v2519_v19, %v370_v57 }
  0xe6   :  { %2005 = vmatprep.mubr.msk.f32.mxu1 %vm2390_vm1, %v2389_v2  ;;  %2004 = vmatpush3.msra.mxu1 %v2512_v17  ;;  %395 = vst.msk [vmem:[#allocation3 + $0x28] sm:$0xff] %vm389_vm4, %v376_v56 }
  0xe7   :  { %2027 = vmatprep.subr.mxu1 %v2389_v2  ;;  %394 = vst.msk [vmem:[#allocation3 + $0x20] sm:$0xff] %vm389_vm4, %v371_v58  ;;  %v2002_v59 = vpop.f32.mrb[6].mxu0 }
  0xe8   :  { %v386_v60 = vadd.f32 %v2002_v59, %v2519_v19  ;;  %v380_v61 = vpop.f32.mrb[7].mxu0 }
  0xe9   :  { %v381_v62 = vadd.f32 %v2519_v19, %v380_v61 }
  0xea   :  { %397 = vst.msk [vmem:[#allocation3 + $0x38] sm:$0xff] %vm389_vm4, %v386_v60  ;;  %v709_v18 = vld [vmem:[#allocation3 + $0x10] sm:$0xff] }
  0xeb   :  { %396 = vst.msk [vmem:[#allocation3 + $0x30] sm:$0xff] %vm389_vm4, %v381_v62  ;;  %v1640_v62 = vld [vmem:[%s2848_s10 + $0x8] sm:$0xff] }
  0xed   :  { %v1171_v52 = vld [vmem:[#allocation3 + $0x28] sm:$0xff] }
  0xee   :  { %v1017_v41 = vld [vmem:[#allocation3 + $0x20] sm:$0xff] }
 0x1b8   :  { %v217_v28 = vpop.f32.mrb[2].mxu1 }
 0x1b9   :  { %v218_v29 = vadd.f32 %v1815_v27, %v217_v28  ;;  %v1988_v30 = vpop.f32.mrb[3].mxu1 }
 0x1bb   :  { %222 = vst.msk [vmem:[#allocation2] sm:$0xff] %vm221_vm5, %v218_v29  ;;  %v863_v29 = vld [vmem:[#allocation3 + $0x18] sm:$0xff] }
 0x1c2   :  { %v2543_v31 = vld [vmem:[#allocation2] sm:$0xff] }
 0x1c3   :  { %400 = vst.msk [vmem:[#allocation4] sm:$0xff] %vm221_vm5, %v2543_v31  ;;  %2006 = vmatmul.mubr.msk.f32.vlgmr.msra.gmra.mrb[4].mxu1 %vm221_vm5, %v2543_v31 }
 0x1c4   :  { %2028 = vmatpush3.msra.mxu1 %v2512_v17  ;;  %2029 = vmatprep.mubr.msk.f32.mxu1 %vm2390_vm1, %v2389_v2 }
 0x1c5   :  { %2241 = vmatprep.subr.bf16.mxu1 %v2391_v6 }
 0x296   :  { %v471_v47 = vpop.f32.mrb[4].mxu1 }
 0x297   :  { %v472_v48 = vadd.f32 %v471_v47, %v401_v46  ;;  %v2007_v49 = vpop.f32.mrb[5].mxu1 }
 0x299   :  { %2349 = vtanh.f32 %v472_v48 }
 0x2a3   :  { %v2350_v50 = vpop.eup %2349 }
 0x2a4   :  { %476 = vst.msk [vmem:[#allocation3] sm:$0xff] %vm389_vm4, %v2350_v50  ;;  %2025 = vmatmul.mubr.msk.f32.vlgmr.msra.gmra.mrb[8].mxu0 %vm389_vm4, %v2350_v50 }
 0x2a5   :  { %2255 = vmatpush3.bf16.msra.mxu0 %v2528_v24  ;;  %2072 = vmatprep.mubr.msk.f32.mxu0 %vm2390_vm1, %v2389_v2 }
 0x2a6   :  { %2256 = vmatprep.subr.bf16.mxu0 %v2391_v6 }
 0x2a9   :  { %2258 = vmatpush3.bf16.msra.mxu0 %v2563_v35 }
 0x2aa   :  { %2259 = vmatprep.subr.bf16.mxu0 %v2391_v6 }
 0x2ad   :  { %2261 = vmatpush3.bf16.msra.mxu0 %v2581_v40 }
 0x2ae   :  { %2262 = vmatprep.subr.bf16.mxu0 %v2391_v6 }
 0x2b1   :  { %2264 = vmatpush3.bf16.msra.mxu0 %v2599_v45 }
 0x2b2   :  { %2099 = vmatprep.subr.mxu0 %v2389_v2 }
 0x377   :  { %v546_v0 = vpop.f32.mrb[8].mxu0 }
 0x378   :  { %v547_v1 = vadd.f32 %v2632_v63, %v546_v0  ;;  %v2026_v3 = vpop.f32.mrb[9].mxu0 }
 0x37a   :  { %v550_v4 = vmul.f32 0.05, %v547_v1  ;;  %v1325_v1 = vld [vmem:[#allocation3 + $0x30] sm:$0xff] }
 0x37c   :  { %v551_v5 = vadd.f32 %v550_v4, %v2543_v31 }
 0x37e   :  { %553 = vst.msk [vmem:[#allocation4 + $0x8] sm:$0xff] %vm221_vm5, %v551_v5  ;;  %2030 = vmatmul.mubr.msk.f32.vlgmr.msra.gmra.mrb[6].mxu1 %vm221_vm5, %v551_v5 }
 0x37f   :  { %2243 = vmatpush3.bf16.msra.mxu1 %v2528_v24  ;;  %2048 = vmatprep.mubr.msk.f32.mxu1 %vm2390_vm1, %v2389_v2 }
 0x380   :  { %2244 = vmatprep.subr.bf16.mxu1 %v2391_v6 }
 0x383   :  { %2246 = vmatpush3.bf16.msra.mxu1 %v2563_v35 }
 0x384   :  { %2247 = vmatprep.subr.bf16.mxu1 %v2391_v6 }
 0x387   :  { %2249 = vmatpush3.bf16.msra.mxu1 %v2581_v40 }
 0x388   :  { %2250 = vmatprep.subr.bf16.mxu1 %v2391_v6 }
 0x38b   :  { %2252 = vmatpush3.bf16.msra.mxu1 %v2599_v45 }
 0x38c   :  { %2051 = vmatprep.subr.mxu1 %v2389_v2 }
 0x451   :  { %v625_v8 = vpop.f32.mrb[6].mxu1 }
 0x452   :  { %v626_v9 = vadd.f32 %v625_v8, %v555_v7  ;;  %v2031_v10 = vpop.f32.mrb[7].mxu1  ;;  %v1641_v7 = vld [vmem:[%s2848_s10 + $0x10] sm:$0xff]  ;;  %v1642_v8 = vld [vmem:[%s2848_s10 + $0x18] sm:$0xff] }
 0x454   :  { %2351 = vtanh.f32 %v626_v9  ;;  %v2329_v9 = vpack.c.bf16 %v1642_v8, %v1641_v7 }
 0x45e   :  { %v2352_v11 = vpop.eup %2351 }
 0x45f   :  { %630 = vst.msk [vmem:[#allocation3 + $0x8] sm:$0xff] %vm389_vm4, %v2352_v11  ;;  %2049 = vmatmul.mubr.msk.f32.vlgmr.msra.gmra.mrb[8].mxu1 %vm389_vm4, %v2352_v11  ;;  %v1643_v11 = vld [vmem:[%s2848_s10 + $0x20] sm:$0xff] }
 0x460   :  { %2052 = vmatpush3.msra.mxu1 %v2512_v17  ;;  %2053 = vmatprep.mubr.msk.f32.mxu1 %vm2390_vm1, %v2389_v2 }
 0x461   :  { %2075 = vmatprep.subr.mxu1 %v2389_v2 }
 0x532   :  { %v700_v12 = vpop.f32.mrb[8].mxu1 }
 0x533   :  { %v701_v13 = vadd.f32 %v2632_v63, %v700_v12  ;;  %v2050_v14 = vpop.f32.mrb[9].mxu1  ;;  %v1644_v12 = vld [vmem:[%s2848_s10 + $0x28] sm:$0xff] }
 0x534   :  { %v2333_v14 = vpack.c.bf16 %v1644_v12, %v1643_v11 }
 0x535   :  { %v704_v15 = vmul.f32 0.05, %v701_v13  ;;  %v1631_v13 = vld [vmem:[#allocation3] sm:$0xff] }
 0x537   :  { %v705_v16 = vadd.f32 %v704_v15, %v551_v5  ;;  %v1645_v15 = vld [vmem:[%s2848_s10 + $0x30] sm:$0xff] }
 0x539   :  { %707 = vst.msk [vmem:[#allocation4 + $0x10] sm:$0xff] %vm221_vm5, %v705_v16  ;;  %2054 = vmatmul.mubr.msk.f32.vlgmr.msra.gmra.mrb[10].mxu1 %vm221_vm5, %v705_v16 }
 0x53a   :  { %2076 = vmatpush3.msra.mxu1 %v2512_v17  ;;  %2077 = vmatprep.mubr.msk.f32.mxu1 %vm2390_vm1, %v2389_v2 }
 0x53b   :  { %2265 = vmatprep.subr.bf16.mxu1 %v2391_v6 }
 0x60c   :  { %v779_v19 = vpop.f32.mrb[10].mxu1 }
 0x60d   :  { %v780_v20 = vadd.f32 %v779_v19, %v709_v18  ;;  %v2055_v21 = vpop.f32.mrb[11].mxu1  ;;  %v1632_v19 = vld [vmem:[#allocation3 + $0x8] sm:$0xff] }
 0x60f   :  { %2353 = vtanh.f32 %v780_v20 }
 0x619   :  { %v2354_v22 = vpop.eup %2353 }
 0x61a   :  { %784 = vst.msk [vmem:[#allocation3 + $0x10] sm:$0xff] %vm389_vm4, %v2354_v22  ;;  %2073 = vmatmul.mubr.msk.f32.vlgmr.msra.gmra.mrb[10].mxu0 %vm389_vm4, %v2354_v22 }
 0x61b   :  { %2100 = vmatpush3.msra.mxu0 %v2512_v17  ;;  %2101 = vmatprep.mubr.msk.f32.mxu0 %vm2390_vm1, %v2389_v2 }
 0x61c   :  { %2277 = vmatprep.subr.bf16.mxu0 %v2391_v6 }
 0x621   :  { %v1633_v20 = vld [vmem:[#allocation3 + $0x10] sm:$0xff] }
 0x6ed   :  { %v854_v23 = vpop.f32.mrb[10].mxu0 }
 0x6ee   :  { %v855_v25 = vadd.f32 %v2632_v63, %v854_v23  ;;  %v2074_v26 = vpop.f32.mrb[11].mxu0 }
 0x6f0   :  { %v858_v27 = vmul.f32 0.05, %v855_v25 }
 0x6f2   :  { %v859_v28 = vadd.f32 %v858_v27, %v705_v16  ;;  %v1646_v16 = vld [vmem:[%s2848_s10 + $0x38] sm:$0xff] }
 0x6f3   :  { %v2337_v18 = vpack.c.bf16 %v1646_v16, %v1645_v15 }
 0x6f4   :  { %861 = vst.msk [vmem:[#allocation4 + $0x18] sm:$0xff] %vm221_vm5, %v859_v28  ;;  %2078 = vmatmul.mubr.msk.f32.vlgmr.msra.gmra.mrb[12].mxu1 %vm221_vm5, %v859_v28 }
 0x6f5   :  { %2267 = vmatpush3.bf16.msra.mxu1 %v2528_v24  ;;  %2096 = vmatprep.mubr.msk.f32.mxu1 %vm2390_vm1, %v2389_v2 }
 0x6f6   :  { %2268 = vmatprep.subr.bf16.mxu1 %v2391_v6 }
 0x6f9   :  { %2270 = vmatpush3.bf16.msra.mxu1 %v2563_v35 }
 0x6fa   :  { %2271 = vmatprep.subr.bf16.mxu1 %v2391_v6 }
 0x6fd   :  { %2273 = vmatpush3.bf16.msra.mxu1 %v2581_v40 }
 0x6fe   :  { %2274 = vmatprep.subr.bf16.mxu1 %v2391_v6 }
 0x701   :  { %2276 = vmatpush3.bf16.msra.mxu1 %v2599_v45 }
 0x702   :  { %2123 = vmatprep.subr.mxu1 %v2389_v2 }
 0x7c7   :  { %v933_v30 = vpop.f32.mrb[12].mxu1 }
 0x7c8   :  { %v934_v31 = vadd.f32 %v933_v30, %v863_v29  ;;  %v2079_v32 = vpop.f32.mrb[13].mxu1 }
 0x7ca   :  { %2355 = vtanh.f32 %v934_v31  ;;  %v1844_v31 = vld [vmem:[%s2849_s11] ss:$0 sm:$0xff] }
 0x7d4   :  { %v2356_v33 = vpop.eup %2355 }
 0x7d5   :  { %938 = vst.msk [vmem:[#allocation3 + $0x18] sm:$0xff] %vm389_vm4, %v2356_v33  ;;  %2097 = vmatmul.mubr.msk.f32.vlgmr.msra.gmra.mrb[14].mxu1 %vm389_vm4, %v2356_v33 }
 0x7d6   :  { %2124 = vmatpush3.msra.mxu1 %v2512_v17  ;;  %2125 = vmatprep.mubr.msk.f32.mxu1 %vm2390_vm1, %v2389_v2 }
 0x7d7   :  { %2289 = vmatprep.subr.bf16.mxu1 %v2391_v6 }
 0x7dc   :  { %v1634_v21 = vld [vmem:[#allocation3 + $0x18] sm:$0xff] }
 0x8a8   :  { %v1008_v34 = vpop.f32.mrb[14].mxu1 }
 0x8a9   :  { %v1009_v36 = vadd.f32 %v2632_v63, %v1008_v34  ;;  %v2098_v37 = vpop.f32.mrb[15].mxu1 }
 0x8ab   :  { %v1012_v38 = vmul.f32 0.05, %v1009_v36 }
 0x8ad   :  { %v1013_v39 = vadd.f32 %v1012_v38, %v859_v28 }
 0x8af   :  { %1015 = vst.msk [vmem:[#allocation4 + $0x20] sm:$0xff] %vm221_vm5, %v1013_v39  ;;  %2102 = vmatmul.mubr.msk.f32.vlgmr.msra.gmra.mrb[12].mxu0 %vm221_vm5, %v1013_v39 }
 0x8b0   :  { %2279 = vmatpush3.bf16.msra.mxu0 %v2528_v24  ;;  %2120 = vmatprep.mubr.msk.f32.mxu0 %vm2390_vm1, %v2389_v2 }
 0x8b1   :  { %2280 = vmatprep.subr.bf16.mxu0 %v2391_v6 }
 0x8b4   :  { %2282 = vmatpush3.bf16.msra.mxu0 %v2563_v35 }
 0x8b5   :  { %2283 = vmatprep.subr.bf16.mxu0 %v2391_v6 }
 0x8b8   :  { %2285 = vmatpush3.bf16.msra.mxu0 %v2581_v40 }
 0x8b9   :  { %2286 = vmatprep.subr.bf16.mxu0 %v2391_v6 }
 0x8bc   :  { %2288 = vmatpush3.bf16.msra.mxu0 %v2599_v45 }
 0x8bd   :  { %2147 = vmatprep.subr.mxu0 %v2389_v2 }
 0x982   :  { %v1087_v42 = vpop.f32.mrb[12].mxu0 }
 0x983   :  { %v1088_v43 = vadd.f32 %v1087_v42, %v1017_v41  ;;  %v2103_v44 = vpop.f32.mrb[13].mxu0 }
 0x985   :  { %2357 = vtanh.f32 %v1088_v43 }
 0x98f   :  { %v2358_v46 = vpop.eup %2357 }
 0x990   :  { %1092 = vst.msk [vmem:[#allocation3 + $0x20] sm:$0xff] %vm389_vm4, %v2358_v46  ;;  %2121 = vmatmul.mubr.msk.f32.vlgmr.msra.gmra.mrb[14].mxu0 %vm389_vm4, %v2358_v46 }
 0x991   :  { %2148 = vmatpush3.msra.mxu0 %v2512_v17  ;;  %2149 = vmatprep.mubr.msk.f32.mxu0 %vm2390_vm1, %v2389_v2 }
 0x992   :  { %2301 = vmatprep.subr.bf16.mxu0 %v2391_v6 }
 0x997   :  { %v1635_v22 = vld [vmem:[#allocation3 + $0x20] sm:$0xff] }
 0xa63   :  { %v1162_v47 = vpop.f32.mrb[14].mxu0 }
 0xa64   :  { %v1163_v48 = vadd.f32 %v2632_v63, %v1162_v47  ;;  %v2122_v49 = vpop.f32.mrb[15].mxu0 }
 0xa66   :  { %v1166_v50 = vmul.f32 0.05, %v1163_v48 }
 0xa68   :  { %v1167_v51 = vadd.f32 %v1166_v50, %v1013_v39 }
 0xa6a   :  { %1169 = vst.msk [vmem:[#allocation4 + $0x28] sm:$0xff] %vm221_vm5, %v1167_v51  ;;  %2126 = vmatmul.mubr.msk.f32.vlgmr.msra.gmra.mrb[16].mxu1 %vm221_vm5, %v1167_v51 }
 0xa6b   :  { %2291 = vmatpush3.bf16.msra.mxu1 %v2528_v24  ;;  %2144 = vmatprep.mubr.msk.f32.mxu1 %vm2390_vm1, %v2389_v2 }
 0xa6c   :  { %2292 = vmatprep.subr.bf16.mxu1 %v2391_v6 }
 0xa6f   :  { %2294 = vmatpush3.bf16.msra.mxu1 %v2563_v35 }
 0xa70   :  { %2295 = vmatprep.subr.bf16.mxu1 %v2391_v6 }
 0xa73   :  { %2297 = vmatpush3.bf16.msra.mxu1 %v2581_v40 }
 0xa74   :  { %2298 = vmatprep.subr.bf16.mxu1 %v2391_v6 }
 0xa77   :  { %2300 = vmatpush3.bf16.msra.mxu1 %v2599_v45 }
 0xa78   :  { %2171 = vmatprep.subr.mxu1 %v2389_v2 }
 0xb3d   :  { %v1241_v53 = vpop.f32.mrb[16].mxu1 }
 0xb3e   :  { %v1242_v54 = vadd.f32 %v1241_v53, %v1171_v52  ;;  %v2127_v55 = vpop.f32.mrb[17].mxu1 }
 0xb40   :  { %2359 = vtanh.f32 %v1242_v54 }
 0xb4a   :  { %v2360_v56 = vpop.eup %2359 }
 0xb4b   :  { %1246 = vst.msk [vmem:[#allocation3 + $0x28] sm:$0xff] %vm389_vm4, %v2360_v56  ;;  %2145 = vmatmul.mubr.msk.f32.vlgmr.msra.gmra.mrb[18].mxu1 %vm389_vm4, %v2360_v56 }
 0xb4c   :  { %2172 = vmatpush3.msra.mxu1 %v2512_v17  ;;  %2173 = vmatprep.mubr.msk.f32.mxu1 %vm2390_vm1, %v2389_v2  ;;  %v1639_v17 = vld [vmem:[%s2848_s10] sm:$0xff] }
 0xb4d   :  { %2313 = vmatprep.subr.bf16.mxu1 %v2391_v6  ;;  %v2325_v0 = vpack.c.bf16 %v1640_v62, %v1639_v17 }
 0xb52   :  { %v1636_v23 = vld [vmem:[#allocation3 + $0x28] sm:$0xff] }
 0xc1e   :  { %v1316_v57 = vpop.f32.mrb[18].mxu1 }
 0xc1f   :  { %v1317_v58 = vadd.f32 %v2632_v63, %v1316_v57  ;;  %v2146_v59 = vpop.f32.mrb[19].mxu1 }
 0xc21   :  { %v1320_v60 = vmul.f32 0.05, %v1317_v58 }
 0xc23   :  { %v1321_v61 = vadd.f32 %v1320_v60, %v1167_v51 }
 0xc25   :  { %1323 = vst.msk [vmem:[#allocation4 + $0x30] sm:$0xff] %vm221_vm5, %v1321_v61  ;;  %2150 = vmatmul.mubr.msk.f32.vlgmr.msra.gmra.mrb[16].mxu0 %vm221_vm5, %v1321_v61 }
 0xc26   :  { %2303 = vmatpush3.bf16.msra.mxu0 %v2528_v24  ;;  %2168 = vmatprep.mubr.msk.f32.mxu0 %vm2390_vm1, %v2389_v2 }
 0xc27   :  { %2304 = vmatprep.subr.bf16.mxu0 %v2391_v6 }
 0xc2a   :  { %2306 = vmatpush3.bf16.msra.mxu0 %v2563_v35 }
 0xc2b   :  { %2307 = vmatprep.subr.bf16.mxu0 %v2391_v6 }
 0xc2e   :  { %2309 = vmatpush3.bf16.msra.mxu0 %v2581_v40 }
 0xc2f   :  { %2310 = vmatprep.subr.bf16.mxu0 %v2391_v6 }
 0xc32   :  { %2312 = vmatpush3.bf16.msra.mxu0 %v2599_v45 }
 0xc33   :  { %2326 = vmatprep.subr.bf16.mxu0 %v2325_v0 }
 0xcf8   :  { %v1395_v3 = vpop.f32.mrb[16].mxu0 }
 0xcf9   :  { %v1396_v4 = vadd.f32 %v1395_v3, %v1325_v1  ;;  %v2151_v5 = vpop.f32.mrb[17].mxu0 }
 0xcfb   :  { %2361 = vtanh.f32 %v1396_v4 }
 0xd05   :  { %v2362_v10 = vpop.eup %2361 }
 0xd06   :  { %1400 = vst.msk [vmem:[#allocation3 + $0x30] sm:$0xff] %vm389_vm4, %v2362_v10  ;;  %2169 = vmatmul.mubr.msk.f32.vlgmr.msra.gmra.mrb[18].mxu0 %vm389_vm4, %v2362_v10 }
 0xd07   :  { %2328 = vmatpush3.bf16.msra.mxu0 %v2325_v0  ;;  %2211 = vmatprep.mubr.msk.f32.mxu0 %vm389_vm4, %v1631_v13 }
 0xd08   :  { %2330 = vmatprep.subr.bf16.mxu0 %v2329_v9 }
 0xd0b   :  { %2332 = vmatpush3.bf16.msra.mxu0 %v2329_v9 }
 0xd0c   :  { %2334 = vmatprep.subr.bf16.mxu0 %v2333_v14 }
 0xd0d   :  { %v1637_v25 = vld [vmem:[#allocation3 + $0x30] sm:$0xff] }
 0xd0f   :  { %2336 = vmatpush3.bf16.msra.mxu0 %v2333_v14 }
 0xd10   :  { %2338 = vmatprep.subr.bf16.mxu0 %v2337_v18 }
 0xd13   :  { %2340 = vmatpush3.bf16.msra.mxu0 %v2337_v18 }
 0xd16   :  { %2212 = vmatmul.mubr.msk.f32.vlgmr.msra.gmra.mrb[20].mxu0 %vm389_vm4, %v1632_v19 }
 0xd17   :  { %2214 = vmatprep.mubr.msk.f32.mxu0 %vm389_vm4, %v1633_v20 }
 0xd1a   :  { %2215 = vmatmul.mubr.msk.f32.gmra.mrb[22].mxu0 %vm389_vm4, %v1634_v21 }
 0xd1b   :  { %2217 = vmatprep.mubr.msk.f32.mxu0 %vm389_vm4, %v1635_v22 }
 0xd1e   :  { %2218 = vmatmul.mubr.msk.f32.gmra.mrb[24].mxu0 %vm389_vm4, %v1636_v23 }
 0xd1f   :  { %2220 = vmatprep.mubr.msk.f32.mxu0 %vm389_vm4, %v1637_v25 }
 0xdd9   :  { %v1470_v26 = vpop.f32.mrb[18].mxu0 }
 0xdda   :  { %v1471_v27 = vadd.f32 %v2632_v63, %v1470_v26  ;;  %v2170_v28 = vpop.f32.mrb[19].mxu0 }
 0xddc   :  { %v1474_v29 = vmul.f32 0.05, %v1471_v27 }
 0xdde   :  { %v2770_v30 = vadd.f32 %v1474_v29, %v1321_v61 }
 0xde0   :  { %1477 = vst.msk [vmem:[#allocation4 + $0x38] sm:$0xff] %vm221_vm5, %v2770_v30  ;;  %2174 = vmatmul.mubr.msk.f32.vlgmr.msra.gmra.mrb[20].mxu1 %vm221_vm5, %v2770_v30 }
 0xde1   :  { %2315 = vmatpush3.bf16.msra.mxu1 %v2528_v24  ;;  %2192 = vmatprep.mubr.msk.f32.mxu1 %vm2390_vm1, %v2389_v2 }
 0xde2   :  { %2316 = vmatprep.subr.bf16.mxu1 %v2391_v6 }
 0xde5   :  { %2318 = vmatpush3.bf16.msra.mxu1 %v2563_v35 }
 0xde6   :  { %2319 = vmatprep.subr.bf16.mxu1 %v2391_v6 }
 0xde9   :  { %v2213_v32 = vpop.f32.mrb[20].mxu0  ;;  %2321 = vmatpush3.bf16.msra.mxu1 %v2581_v40 }
 0xdea   :  { %v1750_v33 = vadd.f32 %v2213_v32, %v1844_v31  ;;  %v1744_v34 = vpop.f32.mrb[21].mxu0  ;;  %2322 = vmatprep.subr.bf16.mxu1 %v2391_v6 }
 0xdeb   :  { %v1745_v24 = vadd.f32 %v1844_v31, %v1744_v34 }
 0xdec   :  { %1785 = vst.msk [vmem:[%s2850_s12 + $0x8] sm:$0xff] %vm1783_vm6, %v1750_v33 }
 0xded   :  { %1784 = vst.msk [vmem:[%s2850_s12] sm:$0xff] %vm1783_vm6, %v1745_v24  ;;  %v2216_v2 = vpop.f32.mrb[22].mxu0  ;;  %2324 = vmatpush3.bf16.msra.mxu1 %v2599_v45  ;;  %v1479_v45 = vld [vmem:[#allocation3 + $0x38] sm:$0xff] }
 0xdee   :  { %v1760_v35 = vadd.f32 %v2216_v2, %v1844_v31  ;;  %v1754_v40 = vpop.f32.mrb[23].mxu0 }
 0xdef   :  { %v1755_v36 = vadd.f32 %v1844_v31, %v1754_v40 }
 0xdf0   :  { %1787 = vst.msk [vmem:[%s2850_s12 + $0x18] sm:$0xff] %vm1783_vm6, %v1760_v35 }
 0xdf1   :  { %1786 = vst.msk [vmem:[%s2850_s12 + $0x10] sm:$0xff] %vm1783_vm6, %v1755_v36  ;;  %v2219_v6 = vpop.f32.mrb[24].mxu0 }
 0xdf2   :  { %v1770_v37 = vadd.f32 %v2219_v6, %v1844_v31  ;;  %v1764_v38 = vpop.f32.mrb[25].mxu0 }
 0xdf3   :  { %v1765_v39 = vadd.f32 %v1844_v31, %v1764_v38 }
 0xdf4   :  { %1789 = vst.msk [vmem:[%s2850_s12 + $0x28] sm:$0xff] %vm1783_vm6, %v1770_v37 }
 0xdf5   :  { %1788 = vst.msk [vmem:[%s2850_s12 + $0x20] sm:$0xff] %vm1783_vm6, %v1765_v39 }
 0xeb3   :  { %v1549_v41 = vpop.f32.mrb[20].mxu1 }
 0xeb4   :  { %v1550_v42 = vadd.f32 %v1549_v41, %v1479_v45  ;;  %v2175_v43 = vpop.f32.mrb[21].mxu1 }
 0xeb6   :  { %2363 = vtanh.f32 %v1550_v42 }
 0xec0   :  { %v2364_v44 = vpop.eup %2363 }
 0xec1   :  { %1554 = vst.msk [vmem:[#allocation3 + $0x38] sm:$0xff] %vm389_vm4, %v2364_v44  ;;  %2193 = vmatmul.mubr.msk.f32.vlgmr.msra.gmra.mrb[22].mxu1 %vm389_vm4, %v2364_v44 }
 0xec8   :  { %v1638_v46 = vld [vmem:[#allocation3 + $0x38] sm:$0xff] }
 0xec9   :  { %2221 = vmatmul.mubr.msk.f32.gmra.mrb[26].mxu0 %vm389_vm4, %v1638_v46 }
 0xeca   :  { %2376 = shalt.err (!%p2373_p4)
}
 0xecb   :  { %s2377_s16 = scalar_lea.hbm %s2851_s13, 1024 }
 0xecc   :  { %p2378_p5 = scmp.ne.s32.totalorder %s2851_s13, %s2377_s16  ;;  %p2381_p6 = scmp.lt.u32.totalorder %s2377_s16, %s2851_s13 }
 0xece   :  { %p2383_p7 = pnand %p2381_p6, %p2378_p5 }
 0xed0   :  { %2386 = shalt.err (!%p2383_p7)
}
 0xed1   :  { %s2393_s21 = smov 128   ;;  %s2394_s22 = smov 8  }
 0xed2   :  { %1805 = dma.vmem_to_hbm [thread:$0]  %s1800_s30, 1024, %s2851_s13, [#allocation5], %s2393_s21, %s2393_s21, %s2394_s22  }
 0xf94   :  { %v1624_v47 = vpop.f32.mrb[22].mxu1 }
 0xf95   :  { %v1625_v48 = vadd.f32 %v2632_v63, %v1624_v47  ;;  %v2194_v49 = vpop.f32.mrb[23].mxu1 }
 0xf97   :  { %v1628_v50 = vmul.f32 0.05, %v1625_v48 }
 0xf99   :  { %v1629_v51 = vadd.f32 %v1628_v50, %v2770_v30 }
 0xf9b   :  { %1630 = vst.msk [vmem:[#allocation2] sm:$0xff] %vm221_vm5, %v1629_v51 }
 0xf9c   :  { %v2222_v52 = vpop.f32.mrb[26].mxu0 }
 0xf9d   :  { %v1780_v53 = vadd.f32 %v2222_v52, %v1844_v31  ;;  %v1774_v54 = vpop.f32.mrb[27].mxu0 }
 0xf9e   :  { %v1775_v55 = vadd.f32 %v1844_v31, %v1774_v54 }
 0xf9f   :  { %1791 = vst.msk [vmem:[%s2850_s12 + $0x38] sm:$0xff] %vm1783_vm6, %v1780_v53 }
 0xfa0   :  { %1790 = vst.msk [vmem:[%s2850_s12 + $0x30] sm:$0xff] %vm1783_vm6, %v1775_v55 }
 0xfa1   :  { %2387 = dma.done.wait [#allocation5], 1024  }
 0xfa2   :  { %2388 = vsyncadd [#allocation5], 4294966272 }
 0xfa3   :  { %1811 = vsyncpa [#allocation5], 1 }

</bundles_post_ra>
